<compile_context>
chip_gen: v7x
topology: tpu7x:2x2x1
jax: 0.10.0
libtpu: 0.0.40
codegen_flags: <defaults>
</compile_context>

<pallas_src>
import functools

import jax
import jax.numpy as jnp
from jax.experimental import pallas as pl
from jax.experimental.pallas import tpu as pltpu


def _dice_sums_kernel(pred_ref, targ_ref, num_ref, den_ref,
                      num_acc, den_acc, *, s_total):
    # pred_ref / targ_ref: (1, C, TS) VMEM blocks (one batch elem, one S tile).
    s = pl.program_id(1)
    n_s = pl.num_programs(1)

    @pl.when(s == 0)
    def _init():
        num_acc[...] = jnp.zeros_like(num_acc)
        den_acc[...] = jnp.zeros_like(den_acc)

    logits = pred_ref[...].astype(jnp.float32)            # (1, C, TS)
    t = targ_ref[...].astype(jnp.float32)                 # (1, C, TS)

    # softmax over the class (sublane) axis  == F.softmax(predict, dim=1)
    m = jnp.max(logits, axis=1, keepdims=True)            # (1, 1, TS)
    e = jnp.exp(logits - m)                                # (1, C, TS)
    denom = jnp.sum(e, axis=1, keepdims=True)              # (1, 1, TS)
    p = e * pl.reciprocal(denom, approx=True)              # (1, C, TS)

    # Mask lanes beyond the true spatial extent (remainder of the last tile).
    ts = logits.shape[-1]
    lane = jax.lax.broadcasted_iota(jnp.int32, logits.shape, 2)
    valid = (s * ts + lane) < s_total

    # Lane-wise accumulation across S tiles (VPU adds only).
    num_acc[...] += jnp.where(valid, p * t, 0.0)
    den_acc[...] += jnp.where(valid, p * p + t * t, 0.0)

    # Single cross-lane reduction + single (1,1,C) store per batch element.
    @pl.when(s == n_s - 1)
    def _finalize():
        num_ref[...] = jnp.sum(num_acc[...], axis=2)[:, None, :]   # (1, 1, C)
        den_ref[...] = jnp.sum(den_acc[...], axis=2)[:, None, :]   # (1, 1, C)


def dice_loss_forward(predict, target, smooth=1.0, weight=None,
                      ignore_index=None, tile_lanes=None):
    """Matches DiceLoss().forward(predict, target) with BinaryDiceLoss defaults
    (smooth=1, p=2, reduction='mean').

    Note: weight / ignore_index are per-class constants, so applying them after
    the batch mean is mathematically identical to the PyTorch per-class loop.
    """
    assert predict.shape == target.shape, "predict & target shape do not match"
    N, C = predict.shape[0], predict.shape[1]
    S = 1
    for d in predict.shape[2:]:
        S *= d

    # Native dtype all the way to VMEM; the f32 cast happens in-kernel.
    pred = predict.reshape(N, C, S)
    targ = target.reshape(N, C, S)

    # Spatial tile size: full extent if small, otherwise a multiple of 128
    # lanes sized well below the v7x 64 MiB VMEM budget
    # (2 inputs x 2 pipeline buffers x C*TS*itemsize + 2 f32 scratches).
    if tile_lanes is None:
        tile_lanes = 8192
    if S <= tile_lanes:
        ts = S
    else:
        ts = max(128, (tile_lanes // 128) * 128)
    n_s = pl.cdiv(S, ts)

    bytes_accessed = (pred.size * pred.dtype.itemsize
                      + targ.size * targ.dtype.itemsize
                      + 2 * N * C * 4)
    cost = pl.CostEstimate(
        flops=8 * N * C * S,            # softmax + masked multiply-accumulates
        transcendentals=N * C * S,      # exp
        bytes_accessed=bytes_accessed,
    )

    num, den = pl.pallas_call(
        functools.partial(_dice_sums_kernel, s_total=S),
        out_shape=(
            jax.ShapeDtypeStruct((N, 1, C), jnp.float32),
            jax.ShapeDtypeStruct((N, 1, C), jnp.float32),
        ),
        grid=(N, n_s),
        in_specs=[
            pl.BlockSpec((1, C, ts), lambda n, s: (n, 0, s)),
            pl.BlockSpec((1, C, ts), lambda n, s: (n, 0, s)),
        ],
        out_specs=(
            pl.BlockSpec((1, 1, C), lambda n, s: (n, 0, 0)),
            pl.BlockSpec((1, 1, C), lambda n, s: (n, 0, 0)),
        ),
        scratch_shapes=[
            pltpu.VMEM((1, C, ts), jnp.float32),   # running sum of p*t
            pltpu.VMEM((1, C, ts), jnp.float32),   # running sum of p^2 + t^2
        ],
        compiler_params=pltpu.CompilerParams(
            dimension_semantics=("parallel", "arbitrary")),
        cost_estimate=cost,
    )(pred, targ)

    num = num.reshape(N, C)
    den = den.reshape(N, C)

    # BinaryDiceLoss per class, reduction='mean' over the batch dimension.
    loss_nc = 1.0 - (num + smooth) / (den + smooth)        # (N, C)
    per_class = jnp.mean(loss_nc, axis=0)                  # (C,)

    if weight is not None:
        per_class = per_class * jnp.asarray(weight, jnp.float32)
    if ignore_index is not None:
        per_class = jnp.where(jnp.arange(C) == ignore_index, 0.0, per_class)

    # total_loss accumulated over classes, then divided by num classes.
    return jnp.sum(per_class) / C


def _reference(predict, target, smooth=1.0):
    # pure-JAX reference mirroring the PyTorch module
    N, C = predict.shape[0], predict.shape[1]
    p = jax.nn.softmax(predict.astype(jnp.float32), axis=1).reshape(N, C, -1)
    t = target.astype(jnp.float32).reshape(N, C, -1)
    total = 0.0
    for i in range(C):
        num = jnp.sum(p[:, i] * t[:, i], axis=1) + smooth
        den = jnp.sum(p[:, i] ** 2 + t[:, i] ** 2, axis=1) + smooth
        total = total + jnp.mean(1.0 - num / den)
    return total / C


if __name__ == "__main__":
    key = jax.random.PRNGKey(0)
    k1, k2 = jax.random.split(key)

    # Small shapes; W=18 makes S=288 so the tiled path also exercises the
    # masked remainder tile (288 = 2*128 + 32).
    N, C, H, W = 2, 4, 16, 18
    predict = jax.random.normal(k1, (N, C, H, W), dtype=jnp.float32)
    # one-hot target over the class axis (NCHW)
    labels = jax.random.randint(k2, (N, H, W), 0, C)
    target = jax.nn.one_hot(labels, C, dtype=jnp.float32).transpose(0, 3, 1, 2)

    ref = jax.block_until_ready(_reference(predict, target))

    # Single full-S tile path.
    out_full = jax.block_until_ready(dice_loss_forward(predict, target))
    # Multi-tile path with a masked remainder tile (128, 128, 32 lanes).
    out_tiled = jax.block_until_ready(
        dice_loss_forward(predict, target, tile_lanes=128))

    # Tolerance is loosened vs. exact-divide because the softmax denominator
    # uses the EUP approximate reciprocal; structural errors are orders of
    # magnitude larger than this.
    assert jnp.allclose(out_full, ref, atol=2e-3, rtol=2e-3), (out_full, ref)
    assert jnp.allclose(out_tiled, ref, atol=2e-3, rtol=2e-3), (out_tiled, ref)
    assert jnp.allclose(out_full, out_tiled, atol=2e-3, rtol=2e-3), (
        out_full, out_tiled)

    print("KERNEL_OK")
</pallas_src>

<mosaic_0001>
module attributes {stable_mosaic.version = 11 : i64} {
  func.func @_dice_sums_kernel(%arg0: i32, %arg1: i32, %arg2: memref<1x4x288xf32, #tpu.memory_space<vmem>>, %arg3: memref<1x4x288xf32, #tpu.memory_space<vmem>>, %arg4: memref<1x1x4xf32, #tpu.memory_space<vmem>>, %arg5: memref<1x1x4xf32, #tpu.memory_space<vmem>>, %arg6: memref<1x4x288xf32, #tpu.memory_space<vmem>>, %arg7: memref<1x4x288xf32, #tpu.memory_space<vmem>>) attributes {dimension_semantics = [#tpu.dimension_semantics<parallel>, #tpu.dimension_semantics<arbitrary>], iteration_bounds = array<i64: 2, 1>, scalar_prefetch = 0 : i64, scratch_operands = 2 : i64, tpu.core_type = #tpu.core_type<tc>, window_params = [{transform_indices = @transform_0, window_bounds = array<i64: 1, 4, 288>}, {transform_indices = @transform_1, window_bounds = array<i64: 1, 4, 288>}, {transform_indices = @transform_2, window_bounds = array<i64: 1, 1, 4>}, {transform_indices = @transform_3, window_bounds = array<i64: 1, 1, 4>}]} {
    %c0_i32 = arith.constant 0 : i32
    %0 = arith.cmpi eq, %arg1, %c0_i32 : i32
    %1 = arith.extui %0 : i1 to i32
    %c0_i32_0 = arith.constant 0 : i32
    %2 = arith.cmpi ne, %1, %c0_i32_0 : i32
    scf.if %2 {
      %cst_24 = arith.constant 0.000000e+00 : f32
      %38 = vector.broadcast %cst_24 : f32 to vector<1x4x288xf32>
      %c0_25 = arith.constant 0 : index
      %c0_26 = arith.constant 0 : index
      %c0_27 = arith.constant 0 : index
      %39 = vector.load %arg6[%c0_25, %c0_26, %c0_27] : memref<1x4x288xf32, #tpu.memory_space<vmem>>, vector<1x4x288xf32>
      tpu.vector_store %arg6[%c0_25, %c0_26, %c0_27], %38 {strides = array<i32>} : memref<1x4x288xf32, #tpu.memory_space<vmem>>, vector<1x4x288xf32>,
      %cst_28 = arith.constant 0.000000e+00 : f32
      %40 = vector.broadcast %cst_28 : f32 to vector<1x4x288xf32>
      %c0_29 = arith.constant 0 : index
      %c0_30 = arith.constant 0 : index
      %c0_31 = arith.constant 0 : index
      %41 = vector.load %arg7[%c0_29, %c0_30, %c0_31] : memref<1x4x288xf32, #tpu.memory_space<vmem>>, vector<1x4x288xf32>
      tpu.vector_store %arg7[%c0_29, %c0_30, %c0_31], %40 {strides = array<i32>} : memref<1x4x288xf32, #tpu.memory_space<vmem>>, vector<1x4x288xf32>,
    } else {
    }
    %c0 = arith.constant 0 : index
    %c0_1 = arith.constant 0 : index
    %c0_2 = arith.constant 0 : index
    %3 = vector.load %arg2[%c0, %c0_1, %c0_2] : memref<1x4x288xf32, #tpu.memory_space<vmem>>, vector<1x4x288xf32>
    %c0_3 = arith.constant 0 : index
    %c0_4 = arith.constant 0 : index
    %c0_5 = arith.constant 0 : index
    %4 = vector.load %arg3[%c0_3, %c0_4, %c0_5] : memref<1x4x288xf32, #tpu.memory_space<vmem>>, vector<1x4x288xf32>
    %cst = arith.constant dense<0xFF800000> : vector<1x288xf32>
    %5 = vector.multi_reduction <maximumf>, %3, %cst [1] : vector<1x4x288xf32> to vector<1x288xf32>
    %6 = vector.shape_cast %5 : vector<1x288xf32> to vector<1x1x288xf32>
    %7 = vector.broadcast %6 : vector<1x1x288xf32> to vector<1x4x288xf32>
    %8 = arith.subf %3, %7 : vector<1x4x288xf32>
    %9 = math.exp %8 : vector<1x4x288xf32>
    %cst_6 = arith.constant dense<0.000000e+00> : vector<1x288xf32>
    %10 = vector.multi_reduction <add>, %9, %cst_6 [1] : vector<1x4x288xf32> to vector<1x288xf32>
    %11 = vector.shape_cast %10 : vector<1x288xf32> to vector<1x1x288xf32>
    %12 = tpu.reciprocal %11 {approx = true} : vector<1x1x288xf32> -> vector<1x1x288xf32>
    %13 = vector.broadcast %12 : vector<1x1x288xf32> to vector<1x4x288xf32>
    %14 = arith.mulf %9, %13 : vector<1x4x288xf32>
    %15 = tpu.iota {dimensions = array<i32: 2>} : vector<1x4x288xi32>
    %c288_i32 = arith.constant 288 : i32
    %16 = arith.muli %arg1, %c288_i32 : i32
    %17 = vector.broadcast %16 : i32 to vector<1x4x288xi32>
    %18 = arith.addi %17, %15 : vector<1x4x288xi32>
    %c288_i32_7 = arith.constant 288 : i32
    %19 = vector.broadcast %c288_i32_7 : i32 to vector<1x4x288xi32>
    %20 = arith.cmpi slt, %18, %19 : vector<1x4x288xi32>
    %c0_8 = arith.constant 0 : index
    %c0_9 = arith.constant 0 : index
    %c0_10 = arith.constant 0 : index
    %21 = vector.load %arg6[%c0_8, %c0_9, %c0_10] : memref<1x4x288xf32, #tpu.memory_space<vmem>>, vector<1x4x288xf32>
    %22 = arith.mulf %14, %4 : vector<1x4x288xf32>
    %cst_11 = arith.constant 0.000000e+00 : f32
    %23 = vector.broadcast %cst_11 : f32 to vector<1x4x288xf32>
    %24 = arith.select %20, %22, %23 : vector<1x4x288xi1>, vector<1x4x288xf32>
    %25 = arith.addf %21, %24 : vector<1x4x288xf32>
    %c0_12 = arith.constant 0 : index
    %c0_13 = arith.constant 0 : index
    %c0_14 = arith.constant 0 : index
    %26 = vector.load %arg6[%c0_12, %c0_13, %c0_14] : memref<1x4x288xf32, #tpu.memory_space<vmem>>, vector<1x4x288xf32>
    tpu.vector_store %arg6[%c0_12, %c0_13, %c0_14], %25 {strides = array<i32>} : memref<1x4x288xf32, #tpu.memory_space<vmem>>, vector<1x4x288xf32>,
    %c0_15 = arith.constant 0 : index
    %c0_16 = arith.constant 0 : index
    %c0_17 = arith.constant 0 : index
    %27 = vector.load %arg7[%c0_15, %c0_16, %c0_17] : memref<1x4x288xf32, #tpu.memory_space<vmem>>, vector<1x4x288xf32>
    %28 = arith.mulf %14, %14 : vector<1x4x288xf32>
    %29 = arith.mulf %4, %4 : vector<1x4x288xf32>
    %30 = arith.addf %28, %29 : vector<1x4x288xf32>
    %cst_18 = arith.constant 0.000000e+00 : f32
    %31 = vector.broadcast %cst_18 : f32 to vector<1x4x288xf32>
    %32 = arith.select %20, %30, %31 : vector<1x4x288xi1>, vector<1x4x288xf32>
    %33 = arith.addf %27, %32 : vector<1x4x288xf32>
    %c0_19 = arith.constant 0 : index
    %c0_20 = arith.constant 0 : index
    %c0_21 = arith.constant 0 : index
    %34 = vector.load %arg7[%c0_19, %c0_20, %c0_21] : memref<1x4x288xf32, #tpu.memory_space<vmem>>, vector<1x4x288xf32>
    tpu.vector_store %arg7[%c0_19, %c0_20, %c0_21], %33 {strides = array<i32>} : memref<1x4x288xf32, #tpu.memory_space<vmem>>, vector<1x4x288xf32>,
    %c0_i32_22 = arith.constant 0 : i32
    %35 = arith.cmpi eq, %arg1, %c0_i32_22 : i32
    %36 = arith.extui %35 : i1 to i32
    %c0_i32_23 = arith.constant 0 : i32
    %37 = arith.cmpi ne, %36, %c0_i32_23 : i32
    scf.if %37 {
      %c0_24 = arith.constant 0 : index
      %c0_25 = arith.constant 0 : index
      %c0_26 = arith.constant 0 : index
      %38 = vector.load %arg6[%c0_24, %c0_25, %c0_26] : memref<1x4x288xf32, #tpu.memory_space<vmem>>, vector<1x4x288xf32>
      %cst_27 = arith.constant dense<0.000000e+00> : vector<1x4xf32>
      %39 = vector.multi_reduction <add>, %38, %cst_27 [2] : vector<1x4x288xf32> to vector<1x4xf32>
      %40 = vector.shape_cast %39 : vector<1x4xf32> to vector<1x1x4xf32>
      %c0_28 = arith.constant 0 : index
      %c0_29 = arith.constant 0 : index
      %c0_30 = arith.constant 0 : index
      %41 = vector.load %arg4[%c0_28, %c0_29, %c0_30] : memref<1x1x4xf32, #tpu.memory_space<vmem>>, vector<1x1x4xf32>
      tpu.vector_store %arg4[%c0_28, %c0_29, %c0_30], %40 {strides = array<i32>} : memref<1x1x4xf32, #tpu.memory_space<vmem>>, vector<1x1x4xf32>,
      %c0_31 = arith.constant 0 : index
      %c0_32 = arith.constant 0 : index
      %c0_33 = arith.constant 0 : index
      %42 = vector.load %arg7[%c0_31, %c0_32, %c0_33] : memref<1x4x288xf32, #tpu.memory_space<vmem>>, vector<1x4x288xf32>
      %cst_34 = arith.constant dense<0.000000e+00> : vector<1x4xf32>
      %43 = vector.multi_reduction <add>, %42, %cst_34 [2] : vector<1x4x288xf32> to vector<1x4xf32>
      %44 = vector.shape_cast %43 : vector<1x4xf32> to vector<1x1x4xf32>
      %c0_35 = arith.constant 0 : index
      %c0_36 = arith.constant 0 : index
      %c0_37 = arith.constant 0 : index
      %45 = vector.load %arg5[%c0_35, %c0_36, %c0_37] : memref<1x1x4xf32, #tpu.memory_space<vmem>>, vector<1x1x4xf32>
      tpu.vector_store %arg5[%c0_35, %c0_36, %c0_37], %44 {strides = array<i32>} : memref<1x1x4xf32, #tpu.memory_space<vmem>>, vector<1x1x4xf32>,
    } else {
    }
    return
  }
  func.func @transform_0(%arg0: i32, %arg1: i32) -> (i32, i32, i32) {
    %c0_i32 = arith.constant 0 : i32
    %c0_i32_0 = arith.constant 0 : i32
    return %arg0, %c0_i32, %arg1 : i32, i32, i32
  }
  func.func @transform_1(%arg0: i32, %arg1: i32) -> (i32, i32, i32) {
    %c0_i32 = arith.constant 0 : i32
    %c0_i32_0 = arith.constant 0 : i32
    return %arg0, %c0_i32, %arg1 : i32, i32, i32
  }
  func.func @transform_2(%arg0: i32, %arg1: i32) -> (i32, i32, i32) {
    %c0_i32 = arith.constant 0 : i32
    %c0_i32_0 = arith.constant 0 : i32
    %c0_i32_1 = arith.constant 0 : i32
    return %arg0, %c0_i32, %c0_i32_0 : i32, i32, i32
  }
  func.func @transform_3(%arg0: i32, %arg1: i32) -> (i32, i32, i32) {
    %c0_i32 = arith.constant 0 : i32
    %c0_i32_0 = arith.constant 0 : i32
    %c0_i32_1 = arith.constant 0 : i32
    return %arg0, %c0_i32, %c0_i32_0 : i32, i32, i32
  }
}

</mosaic_0001>

<bundles_post_ra>
// kernel: tpu_custom_call.1
= control target key start
LH: loop header
LB: loop body
LE: loop exit
PB: predicated region body
PF: predicated region fallthrough
CT: control target
= control target key end

     0   :  { %9 = vsyncpa [#allocation5], 0  ;;  %s1186_s0 = inlined_call_operand.hbm [shape: f32[2,4,288], index: 0, kind: input, shape index: {}]   ;;  %s1187_s1 = inlined_call_operand.hbm [shape: f32[2,4,288], index: 1, kind: input, shape index: {}]   ;;  %s1188_s2 = inlined_call_operand.hbm [shape: f32[2,1,4], index: 2, kind: output, shape index: {0}]   ;;  %s1189_s3 = inlined_call_operand.hbm [shape: f32[2,1,4], index: 3, kind: output, shape index: {1}]  }
   0x1   :  { %11 = vsyncpa [#allocation5 + $0x1], 0 }
   0x2   :  { %12 = vsyncpa [#allocation8], 0 }
   0x3   :  { %14 = vsyncpa [#allocation8 + $0x1], 0 }
   0x4   :  { %15 = vsyncpa [#allocation6], 0 }
   0x5   :  { %17 = vsyncpa [#allocation6 + $0x1], 0 }
   0x6   :  { %18 = vsyncpa [#allocation11], 0 }
   0x7   :  { %20 = vsyncpa [#allocation11 + $0x1], 0  ;;  %s900_s12 = smov 0   ;;  %s902_s13 = smov 0  }
   0x8   :  { %s904_s14 = smov 0   ;;  %s906_s15 = smov 0  }
   0x9   :  { %s908_s16 = smov 0   ;;  %s910_s17 = smov 0  }
   0xa LB: > { %s593_s18 = sadd.s32 4294967295, %s873_s17   ;;  %s594_s19 = sadd.s32 4294967294, %s873_s17   ;;  %s873_s17 = sphi %s910_s17, %s26_s17   ;;  %s869_s16 = sphi %s908_s16, %s1208_s16   ;;  %s865_s15 = sphi %s906_s15, %s1207_s15   ;;  %s861_s14 = sphi %s904_s14, %s1206_s14   ;;  %s857_s13 = sphi %s902_s13, %s1205_s13   ;;  %s853_s12 = sphi %s900_s12, %s1204_s12  }
   0xb   : > { %s38_s20 = sadd.s32 1, %s869_s16  ;;  %s47_s21 = sadd.s32 1, %s861_s14 }
   0xc   : > { %p40_p0 = scmp.ge.s32.totalorder %s38_s20, 2  ;;  %p54_p1 = scmp.ne.s32.totalorder %s861_s14, %s857_s13 }
   0xd   : > { %p55_p2 = scmp.eq.s32.totalorder %s873_s17, 0  ;;  %p60_p3 = scmp.ne.s32.totalorder %s857_s13, %s853_s12 }
   0xe   : > { %s1210_s20 = smov (%p40_p0, %s38_s20), 0  ;;  %p61_p5 = scmp.eq.s32.totalorder %s593_s18, 0 }
   0xf   : > { %p941_p4 = por %p55_p2, %p54_p1  ;;  %s42_s23 = ssub.s32 %s869_s16, %s1210_s20 }
  0x10   : > { %p112_p6 = scmp.eq.s32.totalorder %s593_s18, 1  ;;  %p45_p7 = scmp.eq.s32.totalorder %s42_s23, 0 }
  0x11   : > { %p947_p8 = por %p61_p5, %p60_p3  ;;  %p118_p10 = scmp.eq.s32.totalorder %s594_s19, 1 }
  0x12   : > { %p951_p9 = por %p112_p6, %p54_p1  ;;  %p631_p13 = scmp.lt.s32.totalorder %s873_s17, 2 }
  0x13   : > { %s1193_s24 = scalar_select %p947_p8, 1, 0 }
  0x14   : > { %s1194_s25 = scalar_select %p951_p9, 1, 0 }
  0x15   : > { %s956_s26 = scalar_select %p45_p7, %s861_s14, %s47_s21  }
  0x16   : > { %p958_p11 = por %p118_p10, %p60_p3  ;;  %s965_s28 = sand.u32 1, %s861_s14  }
  0x17   : > { %s604_s29 = smul.u32 12, %s965_s28  ;;  %p971_p0 = pnand %p631_p13, %p941_p4 }
  0x18   : > { %s1195_s27 = scalar_select %p958_p11, 1, 0 }
  0x19   : > { %s605_s30 = smul.u32 192, %s869_s16  ;;  %s168_s8 = scalar_lea.vmem [#allocation4], %s604_s29 }
  0x1a   : > { %s178_s9 = sshll.u32 %s168_s8, 4  ;;  %s165_s10 = scalar_lea.sflag [#allocation5], %s965_s28  ;;  %s985_s9 = int_to_ptr.vmem [resolvable:$true] %s178_s9 }
  0x1b   : > { %s981_s7 = scalar_lea.hbm %s1186_s0, %s605_s30  ;;  %p697_p3 = pneg %p971_p0 }
  0x1c   : > { %s695_s11 = scalar_lea.hbm %s981_s7, 192  ;;  %s700_s21 = scalar_lea.hbm %s1186_s0, 384 }
  0x1d   : > { %p696_p2 = scmp.ne.s32.totalorder %s981_s7, %s695_s11  ;;  %p701_p6 = scmp.lt.u32.totalorder %s981_s7, %s1186_s0 }
  0x1e   : > { %p702_p7 = scmp.lt.u32.totalorder %s700_s21, %s695_s11  ;;  %p704_p13 = scmp.lt.u32.totalorder %s695_s11, %s981_s7 }
  0x1f   : > { %p698_p4 = pnand %p697_p3, %p696_p2 }
  0x20   : > { %p703_p10 = por %p702_p7, %p701_p6 }
  0x21   : > { %p699_p5 = pneg %p698_p4 }
  0x22   : > { %p705_p12 = por %p704_p13, %p703_p10 }
  0x24   : > { %p706_p1 = pnand %p705_p12, %p699_p5 }
  0x26   : > { %709 = shalt.err (!%p706_p1)
}
  0x27   : > { %s710_s5 = scalar_lea.vmem %s985_s9, 192  ;;  %s875_s6 = smov [#allocation4]  }
  0x28   : > { %p711_p2 = scmp.ne.s32.totalorder %s985_s9, %s710_s5  ;;  %s715_s8 = sshll.u32 %s875_s6, 4  ;;  %s716_s8 = int_to_ptr.vmem [resolvable:$false] %s715_s8 }
  0x29   : > { %s717_s18 = scalar_lea.vmem %s716_s8, 384  ;;  %p718_p9 = scmp.lt.s32.totalorder %s985_s9, %s716_s8 }
  0x2a   : > { %p713_p4 = pnand %p711_p2, %p697_p3  ;;  %p719_p6 = scmp.lt.s32.totalorder %s717_s18, %s710_s5 }
  0x2c   : > { %p714_p11 = pneg %p713_p4  ;;  %p720_p7 = por %p719_p6, %p718_p9 }
  0x2e   : > { %p721_p10 = pnand %p720_p7, %p714_p11 }
  0x30   : > { %724 = shalt.err (!%p721_p10)
}
  0x31   : > { %620 = dma.hbm_to_vmem [thread:$0]  (!%p971_p0), %s981_s7, 192, %s985_s9, %s165_s10  }
  0x32   : > { %p204_p12 = scmp.lt.s32.totalorder %s873_s17, 3  ;;  %s1019_s21 = scalar_lea.hbm %s1187_s1, %s605_s30 }
  0x33   : > { %p1197_p9 = scmp.ge.s32.totalorder %s873_s17, 1  ;;  %s189_s23 = scalar_lea.vmem [#allocation7], %s604_s29 }
  0x34   : > { %s199_s5 = sshll.u32 %s189_s23, 4  ;;  %s186_s7 = scalar_lea.sflag [#allocation8], %s965_s28  ;;  %s200_s5 = int_to_ptr.vmem [resolvable:$true] %s199_s5 }
  0x35   : > { %p1023_p11 = pnand %p1197_p9, %p204_p12  ;;  %s725_s9 = scalar_lea.hbm %s1019_s21, 192 }
  0x36   : > { %p726_p1 = scmp.ne.s32.totalorder %s1019_s21, %s725_s9  ;;  %s730_s6 = scalar_lea.hbm %s1187_s1, 384 }
  0x37   : > { %s1198_s22 = scalar_select %p1023_p11, 1, 0 }
  0x38   : > { %p728_p5 = pnand %p726_p1, %p697_p3  ;;  %p731_p2 = scmp.lt.u32.totalorder %s1019_s21, %s1187_s1 }
  0x39   : > { %p732_p4 = scmp.lt.u32.totalorder %s730_s6, %s725_s9  ;;  %p734_p7 = scmp.lt.u32.totalorder %s725_s9, %s1019_s21 }
  0x3a   : > { %p729_p13 = pneg %p728_p5 }
  0x3b   : > { %p733_p6 = por %p732_p4, %p731_p2 }
  0x3d   : > { %p735_p10 = por %p734_p7, %p733_p6 }
  0x3f   : > { %p736_p12 = pnand %p735_p10, %p729_p13 }
  0x41   : > { %739 = shalt.err (!%p736_p12)
}
  0x42   : > { %s740_s28 = scalar_lea.vmem %s200_s5, 192  ;;  %s876_s29 = smov [#allocation7]  }
  0x43   : > { %p741_p9 = scmp.ne.s32.totalorder %s200_s5, %s740_s28  ;;  %s745_s11 = sshll.u32 %s876_s29, 4  ;;  %s746_s11 = int_to_ptr.vmem [resolvable:$false] %s745_s11 }
  0x44   : > { %s747_s19 = scalar_lea.vmem %s746_s11, 384  ;;  %p748_p8 = scmp.lt.s32.totalorder %s200_s5, %s746_s11 }
  0x45   : > { %p743_p1 = pnand %p741_p9, %p697_p3  ;;  %p749_p11 = scmp.lt.s32.totalorder %s747_s19, %s740_s28 }
  0x47   : > { %p744_p5 = pneg %p743_p1  ;;  %p750_p2 = por %p749_p11, %p748_p8 }
  0x49   : > { %p751_p4 = pnand %p750_p2, %p744_p5 }
  0x4b   : > { %754 = shalt.err (!%p751_p4)
}
  0x4c   : > { %623 = dma.hbm_to_vmem [thread:$0]  (!%p971_p0), %s1019_s21, 192, %s200_s5, %s186_s7  }
  0x4d   : > { %p1199_p13 = scmp.ne.s32.totalorder %s1198_s22, 0 }
  0x4e   : > { %s1052_s23 = sand.u32 (!%p1199_p13), 1, %s857_s13   ;;  %p1200_p3 = scmp.ne.s32.totalorder (!%p1199_p13), %s1193_s24, 0 }
  0x4f   : > { %208 = sbr.rel (%p1199_p13) target bundleno = 345 (0x159), region = 28  ;;  %s211_s30 = scalar_lea.sflag (!%p1199_p13), [#allocation5], %s1052_s23 }
  0x50   : > { %s608_s9 = smul.u32 (!%p1199_p13), 12, %s1052_s23 }
  0x52   : > { %s214_s10 = scalar_lea.vmem (!%p1199_p13), [#allocation4], %s608_s9 }
  0x56   : > { %836 = dma.done.wait (%p1200_p3), %s211_s30, 192  }
  0x57   : > { %838 = vsyncadd (%p1200_p3), %s211_s30, 4294967104  ;;  %s220_s4 = scalar_lea.sflag [#allocation8], %s1052_s23  ;;  %s1061_s21 = scalar_lea.vmem [#allocation7], %s608_s9 }
  0x58   : > { %840 = dma.done.wait (%p1200_p3), %s220_s4, 192  }
  0x59   : > { %842 = vsyncadd (%p1200_p3), %s220_s4, 4294967104  ;;  %vm261_vm0 = vcmask 257024   ;;  %v338_v0 = vlaneseq  ;;  %v877_v1 = vmov 0.0   ;;  %vm272_vm1 = vcmask 1043456   ;;  %v265_v5 = vld [vmem:[%s214_s10] sm:$0xff]  ;;  %s600_s24 = sshll.u32 %s865_s15, 4 }
  0x5a   : > { %262 = vst.msk [vmem:[#allocation2 + $0x8] sm:$0xf] %vm261_vm0, %v877_v1  ;;  %264 = vst.msk [vmem:[#allocation3 + $0x8] sm:$0xf] %vm261_vm0, %v877_v1  ;;  %v266_v6 = vld [vmem:[%s214_s10 + $0x8] sm:$0xf]  ;;  %v270_v7 = vcombine.high %v265_v5, %v265_v5  ;;  %s1095_s8 = scalar_lea.hbm %s1188_s2, %s600_s24 }
  0x5b   : > { %v339_v2 = vand.u32 127, %v338_v0  ;;  %v407_v3 = vshrl.u32 %v338_v0, 7  ;;  %v273_v8 = vsel %vm272_vm1, %v265_v5, -inf  ;;  %v288_v9 = vsel %vm261_vm0, %v266_v6, -inf  ;;  %v268_v60 = vld [vmem:[%s1061_s21 + $0x8] sm:$0xf] }
  0x5c   : > { %v274_v10 = vrot.slane %v273_v8, 4  ;;  %v289_v11 = vrot.slane %v288_v9, 4  ;;  %v280_v12 = vsel %vm272_vm1, %v270_v7, -inf  ;;  %v373_v62 = vmul.f32 %v268_v60, %v268_v60  ;;  %s247_s22 = scalar_lea.vmem [#allocation9], %s1052_s23  ;;  %s253_s18 = scalar_lea.vmem [#allocation10], %s1052_s23 }
  0x5d   : > { %v1069_v4 = vsub.s32 %v339_v2, %v407_v3  ;;  %v281_v14 = vrot.slane %v280_v12, 4  ;;  %v341_v58 = vadd.s32 256, %v339_v2  ;;  %s449_s5 = sshll.u32 %s247_s22, 4  ;;  %vm411_vm3 = vcmask 24576   ;;  %s1102_s28 = sshll.u32 %s253_s18, 4  ;;  %s1097_s5 = int_to_ptr.vmem [resolvable:$true] %s449_s5  ;;  %s1136_s28 = int_to_ptr.vmem [resolvable:$true] %s1102_s28 }
  0x5e   : > { %v275_v13 = vmax.f32 %v273_v8, %v274_v10  ;;  %v290_v15 = vmax.f32 %v288_v9, %v289_v11  ;;  %s433_s29 = scalar_lea.sflag [#allocation6], %s1052_s23  ;;  %s755_s11 = scalar_lea.vmem %s1097_s5, 16 }
  0x5f   : > { %v282_v17 = vmax.f32 %v280_v12, %v281_v14  ;;  %vm349_vm2 = vcmp.lt.s32.totalorder %v341_v58, 288  ;;  %v267_v12 = vld [vmem:[%s1061_s21] sm:$0xff]  ;;  %p756_p8 = scmp.ne.s32.totalorder %s1097_s5, %s755_s11  ;;  %p1201_p0 = scmp.ne.s32.totalorder %s1194_s25, 0 }
  0x60   : > { %v276_v16 = vrot.slane %v275_v13, 2  ;;  %v291_v18 = vrot.slane %v290_v15, 2  ;;  %v372_v14 = vmul.f32 %v267_v12, %v267_v12  ;;  %s878_s19 = smov [#allocation9]  }
  0x61   : > { %v283_v20 = vrot.slane %v282_v17, 2  ;;  %v351_v63 = vld [vmem:[#allocation2 + $0x8] sm:$0xf]  ;;  %p757_p11 = pnand %p756_p8, %p1201_p0  ;;  %s759_s9 = sshll.u32 %s878_s19, 4  ;;  %s760_s9 = int_to_ptr.vmem [resolvable:$false] %s759_s9 }
  0x62   : > { %v277_v19 = vmax.f32 %v275_v13, %v276_v16  ;;  %v292_v21 = vmax.f32 %v290_v15, %v291_v18  ;;  %s761_s30 = scalar_lea.vmem %s760_s9, 32  ;;  %p762_p7 = scmp.lt.s32.totalorder %s1097_s5, %s760_s9 }
  0x63   : > { %v284_v23 = vmax.f32 %v282_v17, %v283_v20  ;;  %p758_p6 = pneg %p757_p11  ;;  %p763_p10 = scmp.lt.s32.totalorder %s761_s30, %s755_s11 }
  0x64   : > { %v278_v22 = vrot.slane %v277_v19, 1  ;;  %v293_v24 = vrot.slane %v292_v21, 1 }
  0x65   : > { %v285_v26 = vrot.slane %v284_v23, 1  ;;  %p764_p12 = por %p763_p10, %p762_p7 }
  0x66   : > { %v279_v25 = vmax.f32 %v277_v19, %v278_v22  ;;  %v294_v27 = vmax.f32 %v292_v21, %v293_v24 }
  0x67   : > { %v286_v28 = vmax.f32 %v284_v23, %v285_v26  ;;  %p765_p9 = pnand %p764_p12, %p758_p6 }
  0x68   : > { %v300_v29 = vsub.f32 %v266_v6, %v294_v27  ;;  %v369_v6 = vld [vmem:[#allocation3 + $0x8] sm:$0xf] }
  0x69   : > { %v297_v30 = vcombine.low %v279_v25, %v286_v28 }
  0x6a   : > { %v303_v31 = vmul.f32 1.442695, %v300_v29 }
  0x6b   : > { %v299_v32 = vsub.f32 %v265_v5, %v297_v30 }
  0x6c   : > { %683 = vpow2.f32 %v303_v31 }
  0x6d   : > { %v301_v33 = vmul.f32 1.442695, %v299_v32 }
  0x6f   : > { %685 = vpow2.f32 %v301_v33 }
  0x76   : > { %v684_v34 = vpop.eup %683 }
  0x77   : > { %v322_v35 = vsel %vm261_vm0, %v684_v34, 0.0 }
  0x78   : > { %v323_v36 = vrot.slane %v322_v35, 4 }
  0x79   : > { %v686_v37 = vpop.eup %685 }
  0x7a   : > { %v324_v38 = vadd.f32 %v323_v36, %v322_v35  ;;  %v306_v39 = vcombine.high %v686_v37, %v686_v37  ;;  %v308_v40 = vsel %vm272_vm1, %v686_v37, 0.0 }
  0x7b   : > { %v309_v41 = vrot.slane %v308_v40, 4 }
  0x7c   : > { %v325_v42 = vrot.slane %v324_v38, 2  ;;  %v315_v43 = vsel %vm272_vm1, %v306_v39, 0.0 }
  0x7d   : > { %v310_v44 = vadd.f32 %v309_v41, %v308_v40  ;;  %v316_v45 = vrot.slane %v315_v43, 4 }
  0x7e   : > { %v326_v46 = vadd.f32 %v325_v42, %v324_v38 }
  0x7f   : > { %v311_v47 = vrot.slane %v310_v44, 2  ;;  %v317_v48 = vadd.f32 %v316_v45, %v315_v43 }
  0x80   : > { %v327_v49 = vrot.slane %v326_v46, 1 }
  0x81   : > { %v312_v50 = vadd.f32 %v311_v47, %v310_v44  ;;  %v318_v51 = vrot.slane %v317_v48, 2 }
  0x82   : > { %v328_v52 = vadd.f32 %v327_v49, %v326_v46 }
  0x83   : > { %v313_v53 = vrot.slane %v312_v50, 1  ;;  %v319_v54 = vadd.f32 %v318_v51, %v317_v48 }
  0x84   : > { %687 = vrcp.f32 %v328_v52 }
  0x85   : > { %v314_v55 = vadd.f32 %v313_v53, %v312_v50  ;;  %v320_v56 = vrot.slane %v319_v54, 1 }
  0x87   : > { %v321_v57 = vadd.f32 %v320_v56, %v319_v54  ;;  %689 = vrcp.f32 %v314_v55 }
  0x89   : > { %691 = vrcp.f32 %v321_v57 }
  0x8e   : > { %v688_v59 = vpop.eup %687 }
  0x8f   : > { %v337_v61 = vmul.f32 %v688_v59, %v684_v34 }
  0x91   : > { %v353_v0 = vmul.f32 %v337_v61, %v268_v60  ;;  %v371_v1 = vmul.f32 %v337_v61, %v337_v61  ;;  %v690_v3 = vpop.eup %689 }
  0x93   : > { %v359_v5 = vsel %vm349_vm2, %v353_v0, 0.0  ;;  %v375_v7 = vadd.f32 %v373_v62, %v371_v1  ;;  %v692_v8 = vpop.eup %691 }
  0x94   : > { %v365_v9 = vadd.f32 %v359_v5, %v351_v63  ;;  %v334_v10 = vcombine.low %v690_v3, %v692_v8 }
  0x95   : > { %v381_v11 = vsel %vm349_vm2, %v375_v7, 0.0 }
  0x96   : > { %367 = vst.msk [vmem:[#allocation2 + $0x8] sm:$0xf] %vm261_vm0, %v365_v9  ;;  %v387_v2 = vadd.f32 %v381_v11, %v369_v6  ;;  %v336_v13 = vmul.f32 %v686_v37, %v334_v10 }
  0x98   : > { %389 = vst.msk [vmem:[#allocation3 + $0x8] sm:$0xf] %vm261_vm0, %v387_v2  ;;  %v352_v15 = vmul.f32 %v336_v13, %v267_v12  ;;  %v370_v16 = vmul.f32 %v336_v13, %v336_v13 }
  0x9a   : > { %v355_v17 = vcombine.high %v352_v15, %v352_v15  ;;  %v374_v18 = vadd.f32 %v372_v14, %v370_v16 }
  0x9c   : > { %v362_v19 = vcombine.low %v352_v15, %v355_v17  ;;  %v377_v20 = vcombine.high %v374_v18, %v374_v18  ;;  %v399_v25 = vsel %vm272_vm1, %v355_v17, 0.0 }
  0x9d   : > { %v394_v22 = vld [vmem:[#allocation2 + $0x8] sm:$0xf] }
  0x9e   : > { %v384_v21 = vcombine.low %v374_v18, %v377_v20  ;;  %v398_v23 = vsel %vm272_vm1, %v362_v19, 0.0  ;;  %v401_v26 = vsel %vm261_vm0, %v394_v22, 0.0  ;;  %v419_v29 = vsel %vm272_vm1, %v377_v20, 0.0 }
  0x9f   : > { %v414_v24 = vld [vmem:[#allocation3 + $0x8] sm:$0xf]  ;;  %v400_v28 = vadd.f32 %v399_v25, %v398_v23 }
  0xa0   : > { %v418_v27 = vsel %vm272_vm1, %v384_v21, 0.0  ;;  %v421_v30 = vsel %vm261_vm0, %v414_v24, 0.0 }
  0xa1   : > { %v402_v31 = vadd.f32 %v401_v26, %v400_v28  ;;  %v420_v32 = vadd.f32 %v419_v29, %v418_v27 }
  0xa3   : > { %403 = vadd.xlane.f32.xlu0 %v402_v31  ;;  %v422_v33 = vadd.f32 %v421_v30, %v420_v32 }
  0xa7   : > { %423 = vadd.xlane.f32.xlu0 %v422_v33 }
 0x130   : > { %v404_v34 = vpop.xlane.xlu0 %403 }
 0x131   : > { %v409_v35 = vrot.slane %v404_v34, %v1069_v4 }
 0x133   : > { %412 = vst.msk [vmem:[%s247_s22] sm:$0x1] %vm411_vm3, %v409_v35 }
 0x134   : > { %v424_v36 = vpop.xlane.xlu0 %423 }
 0x135   : > { %768 = shalt.err (!%p765_p9)
}
 0x136   : > { %s769_s10 = scalar_lea.hbm %s1095_s8, 16  ;;  %s773_s22 = scalar_lea.hbm %s1188_s2, 32 }
 0x137   : > { %p770_p1 = scmp.ne.s32.totalorder %s1095_s8, %s769_s10  ;;  %p774_p4 = scmp.lt.u32.totalorder %s1095_s8, %s1188_s2 }
 0x138   : > { %p775_p13 = scmp.lt.u32.totalorder %s773_s22, %s769_s10  ;;  %p777_p8 = scmp.lt.u32.totalorder %s769_s10, %s1095_s8 }
 0x139   : > { %p771_p5 = pnand %p770_p1, %p1201_p0 }
 0x13a   : > { %p776_p3 = por %p775_p13, %p774_p4 }
 0x13b   : > { %p772_p2 = pneg %p771_p5 }
 0x13c   : > { %p778_p11 = por %p777_p8, %p776_p3 }
 0x13e   : > { %p779_p6 = pnand %p778_p11, %p772_p2 }
 0x140   : > { %782 = shalt.err (!%p779_p6)
}
 0x141   : > { %613 = dma.vmem_to_hbm [thread:$0]  (%p1201_p0), %s1097_s5, 16, %s1095_s8, %s433_s29   ;;  %v429_v37 = vrot.slane %v424_v36, %v1069_v4 }
 0x142   : > { %s1133_s9 = scalar_lea.hbm %s1189_s3, %s600_s24  ;;  %s437_s30 = scalar_lea.sflag [#allocation11], %s1052_s23 }
 0x143   : > { %431 = vst.msk [vmem:[%s253_s18] sm:$0x1] %vm411_vm3, %v429_v37  ;;  %s783_s10 = scalar_lea.vmem %s1136_s28, 16  ;;  %s879_s15 = smov [#allocation10]  }
 0x144   : > { %p784_p7 = scmp.ne.s32.totalorder %s1136_s28, %s783_s10  ;;  %s787_s5 = sshll.u32 %s879_s15, 4  ;;  %s788_s5 = int_to_ptr.vmem [resolvable:$false] %s787_s5 }
 0x145   : > { %s789_s8 = scalar_lea.vmem %s788_s5, 32  ;;  %p790_p9 = scmp.lt.s32.totalorder %s1136_s28, %s788_s5 }
 0x146   : > { %p785_p10 = pnand %p784_p7, %p1201_p0  ;;  %p791_p1 = scmp.lt.s32.totalorder %s789_s8, %s783_s10 }
 0x148   : > { %p786_p12 = pneg %p785_p10  ;;  %p792_p5 = por %p791_p1, %p790_p9 }
 0x14a   : > { %p793_p2 = pnand %p792_p5, %p786_p12 }
 0x14c   : > { %796 = shalt.err (!%p793_p2)
}
 0x14d   : > { %s797_s23 = scalar_lea.hbm %s1133_s9, 16  ;;  %s801_s29 = scalar_lea.hbm %s1189_s3, 32 }
 0x14e   : > { %p798_p4 = scmp.ne.s32.totalorder %s1133_s9, %s797_s23  ;;  %p802_p8 = scmp.lt.u32.totalorder %s1133_s9, %s1189_s3 }
 0x14f   : > { %p803_p11 = scmp.lt.u32.totalorder %s801_s29, %s797_s23  ;;  %p805_p7 = scmp.lt.u32.totalorder %s797_s23, %s1133_s9 }
 0x150   : > { %p799_p13 = pnand %p798_p4, %p1201_p0 }
 0x151   : > { %p804_p6 = por %p803_p11, %p802_p8 }
 0x152   : > { %p800_p3 = pneg %p799_p13 }
 0x153   : > { %p806_p10 = por %p805_p7, %p804_p6 }
 0x155   : > { %p807_p12 = pnand %p806_p10, %p800_p3 }
 0x157   : > { %810 = shalt.err (!%p807_p12)
}
 0x158   : > { %614 = dma.vmem_to_hbm [thread:$0]  (%p1201_p0), %s1136_s28, 16, %s1133_s9, %s437_s30  }
 0x159 PF: > { %s474_s22 = sand.u32 1, %s853_s12   ;;  %p1202_p9 = scmp.ne.s32.totalorder %s1195_s27, 0 }
 0x15a   : > { %p1203_p1 = scmp.ge.s32.totalorder %s873_s17, 2  ;;  %s475_s7 = scalar_lea.sflag [#allocation6], %s474_s22 }
 0x15c   : > { %p625_p5 = pnand %p1203_p1, %p1202_p9 }
 0x15e   : > { %844 = dma.done.wait (!%p625_p5), %s475_s7, 16  }
 0x15f   : > { %846 = vsyncadd (!%p625_p5), %s475_s7, 4294967280  ;;  %s483_s6 = scalar_lea.sflag [#allocation11], %s474_s22 }
 0x160   : > { %848 = dma.done.wait (!%p625_p5), %s483_s6, 16  }
 0x161   : > { %850 = vsyncadd (!%p625_p5), %s483_s6, 4294967280  ;;  %s26_s17 = sadd.s32 1, %s873_s17   ;;  %s1204_s12 = smov %s857_s13 }
 0x162   : > { %p23_p2 = scmp.ge.s32.totalorder %s26_s17, 4   ;;  %s1205_s13 = smov %s861_s14 }
 0x163   : > { %s1206_s14 = smov %s956_s26  ;;  %s1207_s15 = smov %s869_s16 }
 0x164   : > { %s1208_s16 = smov %s1210_s20  ;;  %25 = sbr.rel (!%p23_p2) target bundleno = 10 (0xa), region = 111 }
 0x16b   :  { %487 = vsyncpa [#allocation5], 1 }
 0x16c   :  { %489 = vsyncpa [#allocation5 + $0x1], 1 }
 0x16d   :  { %490 = vsyncpa [#allocation8], 1 }
 0x16e   :  { %492 = vsyncpa [#allocation8 + $0x1], 1 }
 0x16f   :  { %493 = vsyncpa [#allocation6], 1 }
 0x170   :  { %495 = vsyncpa [#allocation6 + $0x1], 1 }
 0x171   :  { %496 = vsyncpa [#allocation11], 1 }
 0x172   :  { %498 = vsyncpa [#allocation11 + $0x1], 1 }

</bundles_post_ra>
